<compile_context>
chip_gen: v7x
topology: tpu7x:2x2x1
jax: 0.10.0
libtpu: 0.0.40
codegen_flags: <defaults>
</compile_context>

<pallas_src>
import functools

import jax
import jax.numpy as jnp
from jax.experimental import pallas as pl
from jax.experimental.pallas import tpu as pltpu


def _mlp2a_kernel(x_ref, w_ref, shift_ref, o_ref):
    # MXU matmul with f32 accumulation, fused shift (bias + folded BN) + ReLU.
    y = jnp.dot(x_ref[...], w_ref[...], preferred_element_type=jnp.float32)
    y = y + shift_ref[...]                      # (1, H) broadcast, f32 epilogue
    o_ref[...] = jnp.maximum(y, 0.0).astype(o_ref.dtype)


def mlp2a_forward(x, w, b, gamma, beta, running_mean, running_var,
                  eps=1e-5, tile_n=512, compute_dtype=jnp.bfloat16,
                  out_dtype=None):
    """Eval-mode MLP2A forward.

    x: (N, L) float32
    w: (L, H)  -- note: PyTorch stores (H, L); transpose once before calling.
    b, gamma, beta, running_mean, running_var: (H,)
    compute_dtype: dtype for x / folded weights fed to the MXU (bf16 halves the
                   HBM traffic; accumulation + epilogue stay f32).
    """
    N, L = x.shape
    H = w.shape[1]
    out_dtype = out_dtype if out_dtype is not None else x.dtype

    # Fold BatchNorm (eval) + linear bias:
    #   y = (xW + b - mean) * gamma/sqrt(var+eps) + beta
    #     = x (W * scale) + (b*scale + beta - mean*scale)
    inv_std = jax.lax.rsqrt(running_var + eps)
    scale = gamma * inv_std                                     # (H,)
    w_fold = (w * scale[None, :]).astype(compute_dtype)         # (L, H)
    shift = (b * scale + beta - running_mean * scale).reshape(1, H)
    shift = shift.astype(jnp.float32)                           # f32 epilogue
    x_c = x.astype(compute_dtype)

    # Row-tile the batch dim so Pallas double-buffers x/out DMA against the
    # matmul; W'/shift stay VMEM-resident (constant index_map).  tile_n is a
    # multiple of 8; L and H blocks span the full (small) feature dims.
    tile_n = int(min(tile_n, max(8, ((N + 7) // 8) * 8)))
    grid = (pl.cdiv(N, tile_n),)

    itemsize = jnp.dtype(compute_dtype).itemsize
    cost = pl.CostEstimate(
        flops=2 * N * L * H,
        transcendentals=0,
        bytes_accessed=(N * L + L * H) * itemsize
        + H * 4
        + N * H * jnp.dtype(out_dtype).itemsize,
    )

    return pl.pallas_call(
        _mlp2a_kernel,
        out_shape=jax.ShapeDtypeStruct((N, H), out_dtype),
        grid=grid,
        in_specs=[
            pl.BlockSpec((tile_n, L), lambda i: (i, 0)),   # streamed row tiles
            pl.BlockSpec((L, H), lambda i: (0, 0)),        # resident weights
            pl.BlockSpec((1, H), lambda i: (0, 0)),        # resident shift
        ],
        out_specs=pl.BlockSpec((tile_n, H), lambda i: (i, 0)),
        # "parallel" row axis -> sharded across both TensorCores on v7x;
        # harmless on v5e/v6e.  Default scoped VMEM is plenty for these tiles
        # (raise vmem_limit_bytes only if sweeping tile_n >~ 1K on v5e).
        compiler_params=pltpu.CompilerParams(
            dimension_semantics=("parallel",),
        ),
        cost_estimate=cost,
    )(x_c, w_fold, shift)


def mlp2a_reference(x, w, b, gamma, beta, running_mean, running_var, eps=1e-5):
    y = x @ w + b
    y = (y - running_mean) / jnp.sqrt(running_var + eps) * gamma + beta
    return jnp.maximum(y, 0.0)


def _make_params(key, N, L, H):
    k_x, k_w, k_b, k_g, k_be, k_m, k_v = jax.random.split(key, 7)
    x = jax.random.normal(k_x, (N, L), dtype=jnp.float32)
    bound = 1.0 / jnp.sqrt(jnp.float32(L))
    w = jax.random.uniform(k_w, (L, H), minval=-bound, maxval=bound, dtype=jnp.float32)
    b = jax.random.uniform(k_b, (H,), minval=-bound, maxval=bound, dtype=jnp.float32)
    gamma = 1.0 + 0.1 * jax.random.normal(k_g, (H,), dtype=jnp.float32)
    beta = 0.1 * jax.random.normal(k_be, (H,), dtype=jnp.float32)
    running_mean = 0.05 * jax.random.normal(k_m, (H,), dtype=jnp.float32)
    running_var = 1.0 + 0.1 * jax.random.uniform(k_v, (H,), dtype=jnp.float32)
    return x, w, b, gamma, beta, running_mean, running_var


if __name__ == "__main__":
    key = jax.random.PRNGKey(0)

    # Small shape consistent with the module: (N, L) -> LazyLinear(64).
    N, L, H = 8, 32, 64
    params = _make_params(key, N, L, H)
    x, w, b, gamma, beta, rm, rv = params
    ref = mlp2a_reference(*params)

    # f32 compute path: must match reference tightly.
    out_f32 = jax.block_until_ready(
        mlp2a_forward(x, w, b, gamma, beta, rm, rv, compute_dtype=jnp.float32))
    assert out_f32.shape == (N, H)
    assert jnp.allclose(out_f32, ref, atol=1e-5, rtol=1e-5), "f32 path mismatch"

    # Default bf16 compute path (halved HBM traffic): relaxed tolerance.
    out_bf16 = jax.block_until_ready(
        mlp2a_forward(x, w, b, gamma, beta, rm, rv))
    assert out_bf16.shape == (N, H)
    assert jnp.allclose(out_bf16, ref, atol=3e-2, rtol=3e-2), "bf16 path mismatch"

    # Multi-tile grid path (exercises the row grid / pipelining), still small.
    N2 = 1024
    params2 = _make_params(jax.random.PRNGKey(0), N2, L, H)
    ref2 = mlp2a_reference(*params2)
    out2 = jax.block_until_ready(
        mlp2a_forward(*params2, tile_n=256, compute_dtype=jnp.float32))
    assert out2.shape == (N2, H)
    assert jnp.allclose(out2, ref2, atol=1e-5, rtol=1e-5), "gridded path mismatch"

    print("KERNEL_OK")
</pallas_src>

<mosaic_0001>
module attributes {stable_mosaic.version = 11 : i64} {
  func.func @_mlp2a_kernel(%arg0: i32, %arg1: memref<8x32xf32, #tpu.memory_space<vmem>>, %arg2: memref<32x64xf32, #tpu.memory_space<vmem>>, %arg3: memref<1x64xf32, #tpu.memory_space<vmem>>, %arg4: memref<8x64xf32, #tpu.memory_space<vmem>>) attributes {dimension_semantics = [#tpu.dimension_semantics<parallel>], iteration_bounds = array<i64: 1>, scalar_prefetch = 0 : i64, scratch_operands = 0 : i64, tpu.core_type = #tpu.core_type<tc>, window_params = [{transform_indices = @transform_0, window_bounds = array<i64: 8, 32>}, {pipeline_mode = #tpu.pipeline_mode<synchronous>, transform_indices = @transform_1, window_bounds = array<i64: 32, 64>}, {pipeline_mode = #tpu.pipeline_mode<synchronous>, transform_indices = @transform_2, window_bounds = array<i64: 1, 64>}, {transform_indices = @transform_3, window_bounds = array<i64: 8, 64>}]} {
    %c0 = arith.constant 0 : index
    %c0_0 = arith.constant 0 : index
    %0 = vector.load %arg1[%c0, %c0_0] : memref<8x32xf32, #tpu.memory_space<vmem>>, vector<8x32xf32>
    %c0_1 = arith.constant 0 : index
    %c0_2 = arith.constant 0 : index
    %1 = vector.load %arg2[%c0_1, %c0_2] : memref<32x64xf32, #tpu.memory_space<vmem>>, vector<32x64xf32>
    %cst = arith.constant dense<0.000000e+00> : vector<8x64xf32>
    %2 = tpu.matmul %0, %1, %cst {dimension_numbers = #tpu.dot_dimension_numbers<[1], [0], [0], [1], [0, 0, 1, 1], [], []>} : vector<8x32xf32>, vector<32x64xf32>, vector<8x64xf32> -> vector<8x64xf32>
    %c0_3 = arith.constant 0 : index
    %c0_4 = arith.constant 0 : index
    %3 = vector.load %arg3[%c0_3, %c0_4] : memref<1x64xf32, #tpu.memory_space<vmem>>, vector<1x64xf32>
    %4 = vector.broadcast %3 : vector<1x64xf32> to vector<8x64xf32>
    %5 = arith.addf %2, %4 : vector<8x64xf32>
    %cst_5 = arith.constant 0.000000e+00 : f32
    %6 = vector.broadcast %cst_5 : f32 to vector<8x64xf32>
    %7 = arith.maximumf %5, %6 : vector<8x64xf32>
    %c0_6 = arith.constant 0 : index
    %c0_7 = arith.constant 0 : index
    %8 = vector.load %arg4[%c0_6, %c0_7] : memref<8x64xf32, #tpu.memory_space<vmem>>, vector<8x64xf32>
    tpu.vector_store %arg4[%c0_6, %c0_7], %7 {strides = array<i32>} : memref<8x64xf32, #tpu.memory_space<vmem>>, vector<8x64xf32>,
    return
  }
  func.func @transform_0(%arg0: i32) -> (i32, i32) {
    %c0_i32 = arith.constant 0 : i32
    %c0_i32_0 = arith.constant 0 : i32
    return %arg0, %c0_i32 : i32, i32
  }
  func.func @transform_1(%arg0: i32) -> (i32, i32) {
    %c0_i32 = arith.constant 0 : i32
    %c0_i32_0 = arith.constant 0 : i32
    %c0_i32_1 = arith.constant 0 : i32
    return %c0_i32, %c0_i32_0 : i32, i32
  }
  func.func @transform_2(%arg0: i32) -> (i32, i32) {
    %c0_i32 = arith.constant 0 : i32
    %c0_i32_0 = arith.constant 0 : i32
    %c0_i32_1 = arith.constant 0 : i32
    return %c0_i32, %c0_i32_0 : i32, i32
  }
  func.func @transform_3(%arg0: i32) -> (i32, i32) {
    %c0_i32 = arith.constant 0 : i32
    %c0_i32_0 = arith.constant 0 : i32
    return %arg0, %c0_i32 : i32, i32
  }
}

</mosaic_0001>

<bundles_post_ra>
// kernel: tpu_custom_call.1
= control target key start
LH: loop header
LB: loop body
LE: loop exit
PB: predicated region body
PF: predicated region fallthrough
CT: control target
= control target key end

     0   :  { %8 = vsyncpa [#allocation3], 0  ;;  %s324_s0 = inlined_call_operand.hbm [shape: f32[8,32], index: 0, kind: input, shape index: {}]   ;;  %s325_s1 = inlined_call_operand.hbm [shape: f32[32,64], index: 1, kind: input, shape index: {}]   ;;  %s326_s2 = inlined_call_operand.vmem [shape: f32[1,64], index: 2, kind: input, shape index: {}]   ;;  %s327_s3 = inlined_call_operand.hbm [shape: f32[8,64], index: 3, kind: output, shape index: {}]  }
   0x1   :  { %9 = vsyncpa [#allocation6], 0 }
   0x2   :  { %10 = vsyncpa [#allocation4], 0  ;;  %s250_s12 = smov [#allocation2]   ;;  %s251_s14 = smov [#allocation5]  }
   0x3   :  { %s17_s13 = sshll.u32 %s250_s12, 4  ;;  %s26_s15 = sshll.u32 %s251_s14, 4  ;;  %s18_s13 = int_to_ptr.vmem [resolvable:$true] %s17_s13  ;;  %s278_s15 = int_to_ptr.vmem [resolvable:$true] %s26_s15 }
   0x4   :  { %s178_s18 = scalar_lea.hbm %s324_s0, 128 }
   0x5   :  { %p179_p0 = scmp.ne.s32.totalorder %s324_s0, %s178_s18  ;;  %p182_p1 = scmp.lt.u32.totalorder %s178_s18, %s324_s0 }
   0x7   :  { %p184_p2 = pnand %p182_p1, %p179_p0 }
   0x9   :  { %187 = shalt.err (!%p184_p2)
}
   0xa   :  { %s188_s23 = scalar_lea.vmem %s18_s13, 128  ;;  %p193_p4 = scmp.lt.s32.totalorder %s18_s13, %s18_s13 }
   0xb   :  { %p189_p3 = scmp.ne.s32.totalorder %s18_s13, %s188_s23  ;;  %p194_p5 = scmp.lt.s32.totalorder %s188_s23, %s188_s23 }
   0xd   :  { %p195_p6 = por %p194_p5, %p193_p4 }
   0xf   :  { %p196_p7 = pnand %p195_p6, %p189_p3 }
  0x11   :  { %199 = shalt.err (!%p196_p7)
}
  0x12   :  { %20 = dma.hbm_to_vmem [thread:$0]  %s324_s0, 128, %s18_s13, [#allocation3]  }
  0x13   :  { %s200_s28 = scalar_lea.hbm %s325_s1, 512 }
  0x14   :  { %p201_p8 = scmp.ne.s32.totalorder %s325_s1, %s200_s28  ;;  %p204_p9 = scmp.lt.u32.totalorder %s200_s28, %s325_s1 }
  0x16   :  { %p206_p10 = pnand %p204_p9, %p201_p8 }
  0x18   :  { %209 = shalt.err (!%p206_p10)
}
  0x19   :  { %s210_s6 = scalar_lea.vmem %s278_s15, 512  ;;  %p215_p12 = scmp.lt.s32.totalorder %s278_s15, %s278_s15 }
  0x1a   :  { %p211_p11 = scmp.ne.s32.totalorder %s278_s15, %s210_s6  ;;  %p216_p13 = scmp.lt.s32.totalorder %s210_s6, %s210_s6 }
  0x1c   :  { %p217_p0 = por %p216_p13, %p215_p12 }
  0x1e   :  { %p218_p1 = pnand %p217_p0, %p211_p11 }
  0x20   :  { %221 = shalt.err (!%p218_p1)
}
  0x21   :  { %s252_s0 = smov 128   ;;  %s253_s7 = smov 8  }
  0x22   :  { %32 = dma.hbm_to_vmem [thread:$0]  %s325_s1, 512, %s278_s15, [#allocation6], %s252_s0, %s252_s0, %s253_s7  }
  0x23   :  { %244 = dma.done.wait [#allocation3], 128  }
  0x24   :  { %245 = vsyncadd [#allocation3], 4294967168 }
  0x25   :  { %246 = dma.done.wait [#allocation6], 512  }
  0x26   :  { %247 = vsyncadd [#allocation6], 4294966784  ;;  %v254_v0 = vmov 0.0|0.0   ;;  %vm255_vm0 = vmmov 0   ;;  %v256_v1 = vmov 0.0   ;;  %v42_v2 = vld [vmem:[#allocation5] sm:$0xff] }
  0x27   :  { %164 = vmatprep.subr.bf16.mxu0 %v254_v0  ;;  %161 = vmatprep.mubr.msk.f32.mxu0 %vm255_vm0, %v256_v1  ;;  %v43_v3 = vld [vmem:[#allocation5 + $0x8] sm:$0xff]  ;;  %v44_v4 = vld [vmem:[#allocation5 + $0x10] sm:$0xff]  ;;  %v45_v6 = vld [vmem:[#allocation5 + $0x18] sm:$0xff]  ;;  %vm53_vm1 = vcmask 261120   ;;  %s257_s11 = smov [#allocation7]   ;;  %vm128_vm2 = vcmask 523264  }
  0x28   :  { %v165_v5 = vpack.c.bf16 %v43_v3, %v42_v2  ;;  %v168_v7 = vpack.c.bf16 %v45_v6, %v44_v4  ;;  %v41_v8 = vld [vmem:[#allocation2] sm:$0xff]  ;;  %s136_s12 = sshll.u32 %s257_s11, 4  ;;  %s137_s12 = int_to_ptr.vmem [resolvable:$true] %s136_s12 }
  0x29   :  { %v146_v9 = vld [vmem:[%s326_s2] ss:$0 sm:$0xff]  ;;  %s222_s13 = scalar_lea.vmem %s137_s12, 128  ;;  %p227_p3 = scmp.lt.s32.totalorder %s137_s12, %s137_s12 }
  0x2a   :  { %166 = vmatpush3.bf16.msra.mxu0 %v165_v5  ;;  %p223_p2 = scmp.ne.s32.totalorder %s137_s12, %s222_s13  ;;  %p228_p4 = scmp.lt.s32.totalorder %s222_s13, %s222_s13 }
  0x2b   :  { %167 = vmatprep.subr.bf16.mxu0 %v254_v0 }
  0x2c   :  { %p229_p5 = por %p228_p4, %p227_p3 }
  0x2e   :  { %169 = vmatpush3.bf16.msra.mxu0 %v168_v7  ;;  %p230_p6 = pnand %p229_p5, %p223_p2 }
  0x31   :  { %162 = vmatmul.mubr.msk.f32.vlgmr.msra.gmra.mrb[0].mxu0 %vm53_vm1, %v41_v8 }
 0x104   :  { %v123_v10 = vpop.f32.mrb[0].mxu0 }
 0x105   :  { %v124_v11 = vadd.f32 %v146_v9, %v123_v10  ;;  %v163_v12 = vpop.f32.mrb[1].mxu0 }
 0x107   :  { %v127_v13 = vmax.f32 %v124_v11, 0.0 }
 0x109   :  { %129 = vst.msk [vmem:[#allocation7] sm:$0xff] %vm128_vm2, %v127_v13 }
 0x10a   :  { %233 = shalt.err (!%p230_p6)
}
 0x10b   :  { %s234_s2 = scalar_lea.hbm %s327_s3, 128 }
 0x10c   :  { %p235_p7 = scmp.ne.s32.totalorder %s327_s3, %s234_s2  ;;  %p238_p8 = scmp.lt.u32.totalorder %s234_s2, %s327_s3 }
 0x10e   :  { %p240_p9 = pnand %p238_p8, %p235_p7 }
 0x110   :  { %243 = shalt.err (!%p240_p9)
}
 0x111   :  { %139 = dma.vmem_to_hbm [thread:$0]  %s137_s12, 128, %s327_s3, [#allocation4]  }
 0x112   :  { %248 = dma.done.wait [#allocation4], 128  }
 0x113   :  { %249 = vsyncadd [#allocation4], 4294967168 }
 0x114   :  { %143 = vsyncpa [#allocation3], 1 }
 0x115   :  { %144 = vsyncpa [#allocation6], 1 }
 0x116   :  { %145 = vsyncpa [#allocation4], 1 }

</bundles_post_ra>
